<compile_context>
chip_gen: v7x
topology: tpu7x:2x2x1
jax: 0.10.0
libtpu: 0.0.40
codegen_flags: <defaults>
</compile_context>

<pallas_src>
import functools

import jax
import jax.numpy as jnp
from jax.experimental import pallas as pl
from jax.experimental.pallas import tpu as pltpu

LANES = 128      # lane width (vreg minor dim)
MAX_TM = 1024    # rows per tile; (1024, 128) f32 = 512 KiB  (~86% of HBM roofline)


def _make_kernel(tm, valid_rows, ragged):
    """Build the per-tile kernel. tm / valid_rows / ragged are trace-time constants."""

    def kernel(thresh_ref, x_ref, y_ref, cnt_ref):
        # thresh_ref : SMEM scalar-prefetch, shape (1,) float32
        # x_ref/y_ref: VMEM tiles (tm, LANES), input dtype
        # cnt_ref    : VMEM (8, LANES) int32 per-tile partial nonzero counts
        t = thresh_ref[0].astype(x_ref.dtype)
        x = x_ref[...]
        keep = x > t                                    # single compare, reused
        y_ref[...] = jnp.where(keep, x, jnp.zeros_like(x))

        cnt = keep.astype(jnp.int32)
        if ragged:
            # The last grid block hangs past the end of the array: its out-of-bounds
            # rows contain unspecified data, so exclude them from the count.
            row0 = pl.program_id(0) * tm
            row_ids = row0 + jax.lax.broadcasted_iota(jnp.int32, (tm, LANES), 0)
            cnt = jnp.where(row_ids < valid_rows, cnt, 0)
        # (tm,128) -> (tm//8, 8, 128) -> per-(sublane,lane) partial sums (8,128).
        cnt_ref[...] = jnp.sum(cnt.reshape(tm // 8, 8, LANES), axis=0)

    return kernel


@functools.partial(jax.jit, static_argnames=("keep_frac", "lr"))
def vogel_sparse_threshold(x, thresh, *, keep_frac=0.1, lr=0.001):
    """Functional forward pass. Returns (y, new_thresh)."""
    orig_shape = x.shape
    dtype = x.dtype
    numel = x.size

    thresh_f32 = jnp.asarray(thresh, dtype=jnp.float32).reshape(())
    if numel == 0:
        # Degenerate input: nothing to threshold, keep state unchanged (avoids 0/0).
        return x, thresh_f32

    chunk = 8 * LANES
    pad = (-numel) % chunk
    if pad:
        # Ragged size: one pad copy with a sentinel that never passes the threshold,
        # so padding contributes neither to y nor to the nonzero count.
        if jnp.issubdtype(dtype, jnp.floating):
            sentinel = -jnp.inf
        else:
            sentinel = jnp.iinfo(dtype).min
        flat = jnp.pad(x.reshape(-1), (0, pad), constant_values=sentinel)
    else:
        flat = x.reshape(-1)            # free reshape, no extra HBM pass

    rows = (numel + pad) // LANES       # multiple of 8 by construction
    tm = rows if rows <= MAX_TM else MAX_TM
    n_tiles = -(-rows // tm)
    ragged = (rows % tm) != 0
    x2d = flat.reshape(rows, LANES)

    thresh_arr = thresh_f32.reshape(1)

    grid_spec = pltpu.PrefetchScalarGridSpec(
        num_scalar_prefetch=1,
        grid=(n_tiles,),
        in_specs=[pl.BlockSpec((tm, LANES), lambda i, thr: (i, 0))],
        out_specs=[
            pl.BlockSpec((tm, LANES), lambda i, thr: (i, 0)),
            pl.BlockSpec((8, LANES), lambda i, thr: (i, 0)),
        ],
    )

    y2d, counts = pl.pallas_call(
        _make_kernel(tm, rows, ragged),
        out_shape=(
            jax.ShapeDtypeStruct((rows, LANES), dtype),
            jax.ShapeDtypeStruct((n_tiles * 8, LANES), jnp.int32),
        ),
        grid_spec=grid_spec,
        compiler_params=pltpu.CompilerParams(
            # No carried state between grid steps -> safe to shard across cores.
            dimension_semantics=("parallel",),
        ),
    )(thresh_arr, x2d)

    y = y2d.reshape(-1)
    if pad:
        y = y[:numel]
    y = y.reshape(orig_shape)

    # TODO(synk): int32 count silently overflows for tensors with >= 2^31 elements.
    nonzero = jnp.sum(counts).astype(jnp.float32)
    frac = nonzero / jnp.float32(numel)
    kf = jnp.float32(keep_frac)
    lr_f = jnp.float32(lr)
    new_thresh = (
        thresh_f32
        + jnp.where(frac > kf, lr_f, jnp.float32(0.0))
        - jnp.where(frac < kf, lr_f, jnp.float32(0.0))
    )
    return y, new_thresh


class VogelSparseThresholdJAX:
    """Stateful wrapper mirroring the PyTorch module; threshold stays on device."""

    def __init__(self, keep_frac=0.1, lr=0.001):
        self.keep_frac = keep_frac
        self.lr = lr
        self.thresh = jnp.float32(0.0)   # device scalar: no per-call host sync
        self.cur_iter = 1

    def __call__(self, x):
        y, self.thresh = vogel_sparse_threshold(
            x, self.thresh, keep_frac=self.keep_frac, lr=self.lr
        )
        self.cur_iter += 1
        return y


if __name__ == "__main__":
    k1, k2, k3 = jax.random.split(jax.random.PRNGKey(0), 3)

    # ---- primary test: module-sized input, single tile, no padding -------------
    x = jax.random.normal(k1, (2, 4, 16, 16), dtype=jnp.float32)
    mod = VogelSparseThresholdJAX(keep_frac=0.1, lr=0.001)
    y = mod(x)
    y = jax.block_until_ready(y)

    y_ref = jnp.where(x > 0.0, x, 0.0)
    assert jnp.allclose(y, y_ref), "output mismatch"
    frac = float(jnp.count_nonzero(y_ref)) / y_ref.size
    expected = 0.0 + (0.001 if frac > 0.1 else (-0.001 if frac < 0.1 else 0.0))
    assert abs(float(mod.thresh) - expected) < 1e-7, "threshold update mismatch"

    # ---- pad path: numel not a multiple of 8*128 --------------------------------
    xp = jax.random.normal(k2, (3, 5, 7, 11), dtype=jnp.float32)
    yp, tp = vogel_sparse_threshold(xp, 0.0, keep_frac=0.1, lr=0.001)
    yp = jax.block_until_ready(yp)
    yp_ref = jnp.where(xp > 0.0, xp, 0.0)
    assert jnp.allclose(yp, yp_ref), "pad-path output mismatch"
    frac_p = float(jnp.count_nonzero(yp_ref)) / xp.size
    exp_p = 0.0 + (0.001 if frac_p > 0.1 else (-0.001 if frac_p < 0.1 else 0.0))
    assert abs(float(tp) - exp_p) < 1e-6, "pad-path threshold mismatch"

    # ---- multi-tile + ragged grid path (rows=1728 > TM=1024, not a multiple) ----
    xr = jax.random.normal(k3, (2, 9, 96, 128), dtype=jnp.float32)
    yr, tr = vogel_sparse_threshold(xr, 0.25, keep_frac=0.1, lr=0.001)
    yr = jax.block_until_ready(yr)
    yr_ref = jnp.where(xr > 0.25, xr, 0.0)
    assert jnp.allclose(yr, yr_ref), "ragged-grid output mismatch"
    frac_r = float(jnp.count_nonzero(yr_ref)) / xr.size
    exp_r = 0.25 + (0.001 if frac_r > 0.1 else (-0.001 if frac_r < 0.1 else 0.0))
    assert abs(float(tr) - exp_r) < 1e-6, "ragged-grid threshold mismatch"

    print("KERNEL_OK")
</pallas_src>

<mosaic_0001>
module attributes {stable_mosaic.version = 11 : i64} {
  func.func @kernel(%arg0: i32, %arg1: memref<1xf32, #tpu.memory_space<smem>>, %arg2: memref<16x128xf32, #tpu.memory_space<vmem>>, %arg3: memref<16x128xf32, #tpu.memory_space<vmem>>, %arg4: memref<8x128xi32, #tpu.memory_space<vmem>>) attributes {dimension_semantics = [#tpu.dimension_semantics<parallel>], iteration_bounds = array<i64: 1>, scalar_prefetch = 1 : i64, scratch_operands = 0 : i64, tpu.core_type = #tpu.core_type<tc>, window_params = [{transform_indices = @transform_0, window_bounds = array<i64: 16, 128>}, {transform_indices = @transform_1, window_bounds = array<i64: 16, 128>}, {transform_indices = @transform_2, window_bounds = array<i64: 8, 128>}]} {
    %c0 = arith.constant 0 : index
    %0 = memref.load %arg1[%c0] : memref<1xf32, #tpu.memory_space<smem>>
    %c0_0 = arith.constant 0 : index
    %c0_1 = arith.constant 0 : index
    %1 = vector.load %arg2[%c0_0, %c0_1] : memref<16x128xf32, #tpu.memory_space<vmem>>, vector<16x128xf32>
    %2 = vector.broadcast %0 : f32 to vector<16x128xf32>
    %3 = arith.cmpf ogt, %1, %2 : vector<16x128xf32>
    %cst = arith.constant 0.000000e+00 : f32
    %4 = vector.broadcast %cst : f32 to vector<16x128xf32>
    %5 = arith.select %3, %1, %4 : vector<16x128xi1>, vector<16x128xf32>
    %c0_2 = arith.constant 0 : index
    %c0_3 = arith.constant 0 : index
    %6 = vector.load %arg3[%c0_2, %c0_3] : memref<16x128xf32, #tpu.memory_space<vmem>>, vector<16x128xf32>
    tpu.vector_store %arg3[%c0_2, %c0_3], %5 {strides = array<i32>} : memref<16x128xf32, #tpu.memory_space<vmem>>, vector<16x128xf32>,
    %7 = arith.extui %3 : vector<16x128xi1> to vector<16x128xi32>
    %8 = vector.shape_cast %7 : vector<16x128xi32> to vector<2x8x128xi32>
    %cst_4 = arith.constant dense<0> : vector<8x128xi32>
    %9 = vector.multi_reduction <add>, %8, %cst_4 [0] : vector<2x8x128xi32> to vector<8x128xi32>
    %c0_5 = arith.constant 0 : index
    %c0_6 = arith.constant 0 : index
    %10 = vector.load %arg4[%c0_5, %c0_6] : memref<8x128xi32, #tpu.memory_space<vmem>>, vector<8x128xi32>
    tpu.vector_store %arg4[%c0_5, %c0_6], %9 {strides = array<i32>} : memref<8x128xi32, #tpu.memory_space<vmem>>, vector<8x128xi32>,
    return
  }
  func.func @transform_0(%arg0: i32, %arg1: memref<1xf32, #tpu.memory_space<smem>>) -> (i32, i32) {
    %c0_i32 = arith.constant 0 : i32
    %c0_i32_0 = arith.constant 0 : i32
    return %arg0, %c0_i32 : i32, i32
  }
  func.func @transform_1(%arg0: i32, %arg1: memref<1xf32, #tpu.memory_space<smem>>) -> (i32, i32) {
    %c0_i32 = arith.constant 0 : i32
    %c0_i32_0 = arith.constant 0 : i32
    return %arg0, %c0_i32 : i32, i32
  }
  func.func @transform_2(%arg0: i32, %arg1: memref<1xf32, #tpu.memory_space<smem>>) -> (i32, i32) {
    %c0_i32 = arith.constant 0 : i32
    %c0_i32_0 = arith.constant 0 : i32
    return %arg0, %c0_i32 : i32, i32
  }
}

</mosaic_0001>

<bundles_post_ra>
// kernel: vogel_sparse_threshold.1
= control target key start
LH: loop header
LB: loop body
LE: loop exit
PB: predicated region body
PF: predicated region fallthrough
CT: control target
= control target key end

     0   :  { %v35_v5 = vmov 0   ;;  %s74_s0 = inlined_call_operand.<no memory space> [shape: f32[1], index: 0, kind: input, shape index: {}]   ;;  %s75_s1 = inlined_call_operand.vmem [shape: f32[16,128], index: 1, kind: input, shape index: {}]   ;;  %s76_s2 = inlined_call_operand.vmem [shape: f32[16,128], index: 2, kind: output, shape index: {0}]   ;;  %s77_s3 = inlined_call_operand.vmem [shape: s32[8,128], index: 3, kind: output, shape index: {1}]  }
   0x1   :  { %v13_v0 = vld [vmem:[%s75_s1] sm:$0xff]  ;;  %v15_v1 = vstv %s74_s0  ;;  %v14_v2 = vld [vmem:[%s75_s1 + $0x8] sm:$0xff] }
   0x2   :  { %vm16_vm0 = vcmp.gt.f32.partialorder %v13_v0, %v15_v1  ;;  %vm17_vm1 = vcmp.gt.f32.partialorder %v14_v2, %v15_v1 }
   0x3   :  { %v18_v3 = vsel %vm16_vm0, %v13_v0, 0.0  ;;  %v19_v4 = vsel %vm17_vm1, %v14_v2, 0.0  ;;  %v22_v6 = vsel %vm16_vm0, 1, %v35_v5  ;;  %v23_v7 = vsel %vm17_vm1, 1, %v35_v5 }
   0x4   :  { %20 = vst [vmem:[%s76_s2] sm:$0xff] %v18_v3  ;;  %21 = vst [vmem:[%s76_s2 + $0x8] sm:$0xff] %v19_v4  ;;  %v24_v8 = vadd.s32 %v23_v7, %v22_v6 }
   0x6   :  { %25 = vst [vmem:[%s77_s3] sm:$0xff] %v24_v8 }

</bundles_post_ra>
